<compile_context>
chip_gen: v5e
topology: v5e:2x2
jax: 0.10.0
libtpu: 0.0.40
codegen_flags: <defaults>
</compile_context>

<pallas_src>
import functools

import numpy as np
import jax
import jax.numpy as jnp
from jax.experimental import pallas as pl
from jax.experimental.pallas import tpu as pltpu


_LOG10_INV = np.float32(1.0 / np.log(10.0))


def _round_up(x, m):
    return ((x + m - 1) // m) * m


def _choose_tiling(F, target=512):
    """Pick (tile_f, F_pad).

    - tile rows are a multiple of 8 (f32 sublane), capped at `target`
    - the number of grid steps is even so v7x's two TensorCores both get work
      (no-op on v5e/v6e which have one TC)
    """
    steps = 2 * max(1, -(-F // (2 * target)))          # even, >= 2
    tile_f = max(8, _round_up(-(-F // steps), 8))
    F_pad = _round_up(F, tile_f)
    if (F_pad // tile_f) % 2:                          # keep step count even
        F_pad += tile_f
    return tile_f, F_pad


# ----------------------------------------------------------------------------
# Deterministic parameter construction (mirrors Audio2Mel.__init__)
# ----------------------------------------------------------------------------
def hann_window(win_length):
    # torch.hann_window(N) (periodic): w[n] = 0.5 * (1 - cos(2*pi*n/N))
    n = np.arange(win_length, dtype=np.float64)
    return (0.5 * (1.0 - np.cos(2.0 * np.pi * n / win_length))).astype(np.float32)


def mel_filterbank(sr, n_fft, n_mels, fmin, fmax):
    # Slaney-scale mel filterbank with slaney area-normalization: matches the
    # defaults of librosa_mel_fn used by the PyTorch module (computed in-script,
    # no librosa import / file reads).
    if fmax is None:
        fmax = sr / 2.0
    n_freq = n_fft // 2 + 1

    f_sp = 200.0 / 3.0
    min_log_hz = 1000.0
    min_log_mel = min_log_hz / f_sp
    logstep = np.log(6.4) / 27.0

    def hz_to_mel(f):
        f = np.asarray(f, dtype=np.float64)
        lin = f / f_sp
        log = min_log_mel + np.log(np.maximum(f, min_log_hz) / min_log_hz) / logstep
        return np.where(f >= min_log_hz, log, lin)

    def mel_to_hz(m):
        m = np.asarray(m, dtype=np.float64)
        lin = m * f_sp
        log = min_log_hz * np.exp(logstep * (m - min_log_mel))
        return np.where(m >= min_log_mel, log, lin)

    mel_pts = np.linspace(hz_to_mel(fmin), hz_to_mel(fmax), n_mels + 2)
    hz_pts = mel_to_hz(mel_pts)                          # (n_mels + 2,)
    fftfreqs = np.linspace(0.0, sr / 2.0, n_freq)        # (n_freq,)

    fdiff = np.diff(hz_pts)                              # (n_mels + 1,)
    ramps = hz_pts[:, None] - fftfreqs[None, :]          # (n_mels + 2, n_freq)
    lower = -ramps[:-2] / fdiff[:-1][:, None]
    upper = ramps[2:] / fdiff[1:][:, None]
    weights = np.maximum(0.0, np.minimum(lower, upper))  # (n_mels, n_freq)

    enorm = 2.0 / (hz_pts[2:n_mels + 2] - hz_pts[:n_mels])
    weights *= enorm[:, None]
    return weights.astype(np.float32)                    # (n_mels, n_freq)


def dft_bases(n_fft):
    # Unwindowed real-input DFT bases, used only by the pure-JAX reference.
    n_freq = n_fft // 2 + 1
    n = np.arange(n_fft, dtype=np.float64)[:, None]      # (n_fft, 1)
    f = np.arange(n_freq, dtype=np.float64)[None, :]     # (1, n_freq)
    ang = 2.0 * np.pi * n * f / n_fft
    cos_b = np.cos(ang).astype(np.float32)               # (n_fft, n_freq)
    sin_b = (-np.sin(ang)).astype(np.float32)            # (n_fft, n_freq)
    return cos_b, sin_b


def windowed_dft_basis(n_fft, window, n_freq_pad):
    """Fused, window-folded, lane-padded DFT basis.

        basis[n, k]              =  window[n] * cos(2*pi*n*k/n_fft)   (k < n_freq)
        basis[n, n_freq_pad + k] = -window[n] * sin(2*pi*n*k/n_fft)   (k < n_freq)

    Padded frequency columns are zero, so they contribute nothing downstream.
    Shape: (n_fft, 2 * n_freq_pad).
    """
    n_freq = n_fft // 2 + 1
    n = np.arange(n_fft, dtype=np.float64)[:, None]
    f = np.arange(n_freq, dtype=np.float64)[None, :]
    ang = 2.0 * np.pi * n * f / n_fft
    w = np.asarray(window, dtype=np.float64)[:, None]
    basis = np.zeros((n_fft, 2 * n_freq_pad), dtype=np.float32)
    basis[:, :n_freq] = (w * np.cos(ang)).astype(np.float32)
    basis[:, n_freq_pad:n_freq_pad + n_freq] = (-(w * np.sin(ang))).astype(np.float32)
    return basis


def _frame_signal(x, n_fft, hop):
    """Frame a padded signal (B, L) -> (B, n_frames, n_fft) without a gather.

    When hop divides n_fft, frames are assembled from n_fft/hop shifted static
    slices of a (L/hop, hop) reshape (lowered as plain DMA copies on TPU).
    Falls back to advanced indexing otherwise.
    """
    B, L = x.shape
    n_frames = 1 + (L - n_fft) // hop
    if n_fft % hop == 0:
        r = n_fft // hop
        L_pad = _round_up(L, hop)
        if L_pad != L:
            x = jnp.pad(x, ((0, 0), (0, L_pad - L)))
        xr = x.reshape(B, L_pad // hop, hop)
        cols = [xr[:, k:k + n_frames, :] for k in range(r)]   # static slices
        frames = jnp.stack(cols, axis=2).reshape(B, n_frames, n_fft)
    else:
        idx = (np.arange(n_frames)[:, None] * hop
               + np.arange(n_fft)[None, :])
        frames = x[:, idx]
    return frames


# ----------------------------------------------------------------------------
# Pallas kernel: fused (windowed) DFT matmul -> |.| -> mel matmul -> log10
# ----------------------------------------------------------------------------
def audio2mel_kernel(frames_ref, basis_ref, mel_t_ref, out_ref, *,
                     n_freq_pad, mm_dtype):
    # Single wide MXU matmul: (tile_f, n_fft) @ (n_fft, 2*n_freq_pad), f32 acc.
    frames = frames_ref[...].astype(mm_dtype)
    ri = jnp.dot(frames, basis_ref[...],
                 preferred_element_type=jnp.float32)          # (tile_f, 2*n_freq_pad)
    real = ri[:, :n_freq_pad]                                 # lane-aligned static slices
    imag = ri[:, n_freq_pad:]
    mag = jnp.sqrt(real * real + imag * imag)                 # (tile_f, n_freq_pad)
    mel = jnp.dot(mag.astype(mm_dtype), mel_t_ref[...],
                  preferred_element_type=jnp.float32)         # (tile_f, n_mel_pad)
    mel = jnp.maximum(mel, jnp.float32(1e-5))                 # clamp(min=1e-5)
    out_ref[...] = jnp.log(mel) * _LOG10_INV                  # log10


def audio2mel_pallas(frames, basis, mel_t, *, tile_f):
    F_pad, n_fft = frames.shape
    two_nf = basis.shape[1]
    n_freq_pad = two_nf // 2
    n_mel_pad = mel_t.shape[1]
    assert F_pad % tile_f == 0
    mm_dtype = basis.dtype
    mm_sz = basis.dtype.itemsize

    # Explicit VMEM budget (v5e's scoped default is only 16 MiB):
    #   frames tile double-buffered + single-buffered bases + f32 intermediates
    #   + bf16 cast copies + double-buffered output, with headroom.
    est = (2 * tile_f * n_fft * 4
           + n_fft * two_nf * mm_sz
           + n_freq_pad * n_mel_pad * mm_sz
           + 2 * tile_f * n_mel_pad * 4
           + tile_f * (two_nf + n_freq_pad) * 4
           + tile_f * (n_fft + n_freq_pad) * mm_sz)
    vmem_limit = min(max(32 << 20, int(est * 1.5) + (4 << 20)), 64 << 20)

    grid = (F_pad // tile_f,)
    kernel = functools.partial(audio2mel_kernel,
                               n_freq_pad=n_freq_pad, mm_dtype=mm_dtype)
    return pl.pallas_call(
        kernel,
        out_shape=jax.ShapeDtypeStruct((F_pad, n_mel_pad), jnp.float32),
        grid_spec=pltpu.PrefetchScalarGridSpec(
            num_scalar_prefetch=0,
            grid=grid,
            in_specs=[
                # frames tile (pipelined, double-buffered)
                pl.BlockSpec((tile_f, n_fft), lambda i: (i, 0)),
                # grid-invariant fused DFT basis: single-buffered resident block
                pl.BlockSpec((n_fft, two_nf), lambda i: (0, 0),
                             pipeline_mode=pl.Buffered(1)),
                # grid-invariant mel basis^T: single-buffered resident block
                pl.BlockSpec((n_freq_pad, n_mel_pad), lambda i: (0, 0),
                             pipeline_mode=pl.Buffered(1)),
            ],
            out_specs=pl.BlockSpec((tile_f, n_mel_pad), lambda i: (i, 0)),  # lane-dense (128)
        ),
        compiler_params=pltpu.CompilerParams(
            dimension_semantics=("parallel",),
            vmem_limit_bytes=vmem_limit,
        ),
    )(frames, basis, mel_t)


# ----------------------------------------------------------------------------
# Module-equivalent wrapper
# ----------------------------------------------------------------------------
class Audio2MelPallas:
    def __init__(self, sampling_rate, n_fft, hop_length, win_length,
                 n_mel_channels, mel_fmin, mel_fmax,
                 compute_dtype=jnp.bfloat16):
        self.n_fft = n_fft
        self.hop_length = hop_length
        self.win_length = win_length
        self.n_mel = n_mel_channels
        self.compute_dtype = compute_dtype

        n_freq = n_fft // 2 + 1
        self.n_freq_pad = _round_up(n_freq, 128)
        self.n_mel_pad = _round_up(n_mel_channels, 128)

        win = hann_window(win_length)
        if win_length < n_fft:
            # torch.stft center-pads the window to n_fft
            lpad = (n_fft - win_length) // 2
            win = np.pad(win, (lpad, n_fft - win_length - lpad))

        # Fused (cos | -sin) basis with the window folded in, freq padded to 128*,
        # stored in the matmul compute dtype (bf16 by default).
        basis_np = windowed_dft_basis(n_fft, win, self.n_freq_pad)     # (n_fft, 2*n_freq_pad)
        self.basis = jnp.asarray(basis_np, dtype=compute_dtype)

        mel = mel_filterbank(sampling_rate, n_fft, n_mel_channels, mel_fmin, mel_fmax)
        mel_t = np.zeros((self.n_freq_pad, self.n_mel_pad), dtype=np.float32)
        mel_t[:n_freq, :n_mel_channels] = mel.T
        self.mel_t = jnp.asarray(mel_t, dtype=compute_dtype)           # (n_freq_pad, n_mel_pad)

        # Unpadded/unfused f32 copies for the pure-JAX reference.
        self._ref_window = jnp.asarray(win)                            # (n_fft,)
        cos_b, sin_b = dft_bases(n_fft)
        self._ref_cos = jnp.asarray(cos_b)                             # (n_fft, n_freq)
        self._ref_sin = jnp.asarray(sin_b)                             # (n_fft, n_freq)
        self._ref_mel_t = jnp.asarray(mel.T)                           # (n_freq, n_mel)

    def __call__(self, audio):
        # audio: (B, 1, T) float32  (PyTorch NCW layout)
        B, C, T = audio.shape
        assert C == 1
        p = (self.n_fft - self.hop_length) // 2
        x = jnp.pad(audio[:, 0, :], ((0, 0), (p, p)), mode="reflect")  # (B, T + 2p)

        # Frame the signal via shifted static slices (no gather on TPU).
        frames = _frame_signal(x, self.n_fft, self.hop_length)         # (B, n_frames, n_fft)
        n_frames = frames.shape[1]
        frames = frames.reshape(B * n_frames, self.n_fft).astype(jnp.float32)

        F = B * n_frames
        tile_f, F_pad = _choose_tiling(F)
        if F_pad != F:
            frames = jnp.pad(frames, ((0, F_pad - F), (0, 0)))         # dummy zero frames

        out = audio2mel_pallas(frames, self.basis, self.mel_t,
                               tile_f=tile_f)                          # (F_pad, n_mel_pad)
        out = out[:F, :self.n_mel].reshape(B, n_frames, self.n_mel)
        return jnp.transpose(out, (0, 2, 1))                           # (B, n_mel, n_frames)

    # Pure-JAX reference (same math as the PyTorch module, no Pallas, f32,
    # naive gather-based framing for independence from the kernel path).
    def reference(self, audio):
        B, _, T = audio.shape
        p = (self.n_fft - self.hop_length) // 2
        x = jnp.pad(audio[:, 0, :], ((0, 0), (p, p)), mode="reflect")
        L = T + 2 * p
        n_frames = 1 + (L - self.n_fft) // self.hop_length
        idx = (np.arange(n_frames)[:, None] * self.hop_length
               + np.arange(self.n_fft)[None, :])
        frames = x[:, idx] * self._ref_window[None, None, :]
        real = jnp.einsum("bfn,nk->bfk", frames, self._ref_cos)
        imag = jnp.einsum("bfn,nk->bfk", frames, self._ref_sin)
        mag = jnp.sqrt(real * real + imag * imag)
        mel = jnp.einsum("bfk,km->bfm", mag, self._ref_mel_t)
        out = jnp.log10(jnp.maximum(mel, 1e-5))
        return jnp.transpose(out, (0, 2, 1))


if __name__ == "__main__":
    # Small, module-consistent hyperparameters.
    sampling_rate = 16000
    n_fft = 128
    hop_length = 32
    win_length = 128
    n_mel_channels = 16
    mel_fmin = 0.0
    mel_fmax = 8000.0

    B, T = 2, 256
    key = jax.random.PRNGKey(0)
    audio = jax.random.normal(key, (B, 1, T), dtype=jnp.float32)       # (B, 1, T)

    # f32 compute path: tight-tolerance correctness check.
    m_f32 = Audio2MelPallas(sampling_rate, n_fft, hop_length, win_length,
                            n_mel_channels, mel_fmin, mel_fmax,
                            compute_dtype=jnp.float32)
    # bf16 compute path (default / fast): looser tolerances.
    m_bf16 = Audio2MelPallas(sampling_rate, n_fft, hop_length, win_length,
                             n_mel_channels, mel_fmin, mel_fmax,
                             compute_dtype=jnp.bfloat16)

    ref = jax.block_until_ready(m_f32.reference(audio))

    out_f32 = jax.block_until_ready(m_f32(audio))
    assert out_f32.shape == ref.shape, (out_f32.shape, ref.shape)
    np.testing.assert_allclose(np.asarray(out_f32), np.asarray(ref),
                               rtol=2e-4, atol=5e-4)

    out_bf16 = jax.block_until_ready(m_bf16(audio))
    assert out_bf16.shape == ref.shape, (out_bf16.shape, ref.shape)
    np.testing.assert_allclose(np.asarray(out_bf16), np.asarray(ref),
                               rtol=2e-2, atol=5e-2)

    print("KERNEL_OK")
</pallas_src>

<mosaic_0001>
module attributes {stable_mosaic.version = 11 : i64} {
  func.func @audio2mel_kernel(%arg0: i32, %arg1: memref<8x128xf32, #tpu.memory_space<vmem>>, %arg2: memref<128x256xf32, #tpu.memory_space<vmem>>, %arg3: memref<128x128xf32, #tpu.memory_space<vmem>>, %arg4: memref<8x128xf32, #tpu.memory_space<vmem>>) attributes {dimension_semantics = [#tpu.dimension_semantics<parallel>], iteration_bounds = array<i64: 2>, scalar_prefetch = 0 : i64, scratch_operands = 0 : i64, tpu.core_type = #tpu.core_type<tc>, window_params = [{transform_indices = @transform_0, window_bounds = array<i64: 8, 128>}, {pipeline_mode = #tpu.pipeline_mode<synchronous>, transform_indices = @transform_1, window_bounds = array<i64: 128, 256>}, {pipeline_mode = #tpu.pipeline_mode<synchronous>, transform_indices = @transform_2, window_bounds = array<i64: 128, 128>}, {transform_indices = @transform_3, window_bounds = array<i64: 8, 128>}]} {
    %c0 = arith.constant 0 : index
    %c0_0 = arith.constant 0 : index
    %0 = vector.load %arg1[%c0, %c0_0] : memref<8x128xf32, #tpu.memory_space<vmem>>, vector<8x128xf32>
    %c0_1 = arith.constant 0 : index
    %c0_2 = arith.constant 0 : index
    %1 = vector.load %arg2[%c0_1, %c0_2] : memref<128x256xf32, #tpu.memory_space<vmem>>, vector<128x256xf32>
    %cst = arith.constant dense<0.000000e+00> : vector<8x256xf32>
    %2 = tpu.matmul %0, %1, %cst {dimension_numbers = #tpu.dot_dimension_numbers<[1], [0], [0], [1], [0, 0, 1, 1], [], []>} : vector<8x128xf32>, vector<128x256xf32>, vector<8x256xf32> -> vector<8x256xf32>
    %3 = vector.extract_strided_slice %2 {offsets = [0, 0], sizes = [8, 128], strides = [1, 1]} : vector<8x256xf32> to vector<8x128xf32>
    %4 = vector.extract_strided_slice %2 {offsets = [0, 128], sizes = [8, 128], strides = [1, 1]} : vector<8x256xf32> to vector<8x128xf32>
    %5 = arith.mulf %3, %3 : vector<8x128xf32>
    %6 = arith.mulf %4, %4 : vector<8x128xf32>
    %7 = arith.addf %5, %6 : vector<8x128xf32>
    %8 = math.sqrt %7 : vector<8x128xf32>
    %c0_3 = arith.constant 0 : index
    %c0_4 = arith.constant 0 : index
    %9 = vector.load %arg3[%c0_3, %c0_4] : memref<128x128xf32, #tpu.memory_space<vmem>>, vector<128x128xf32>
    %cst_5 = arith.constant dense<0.000000e+00> : vector<8x128xf32>
    %10 = tpu.matmul %8, %9, %cst_5 {dimension_numbers = #tpu.dot_dimension_numbers<[1], [0], [0], [1], [0, 0, 1, 1], [], []>} : vector<8x128xf32>, vector<128x128xf32>, vector<8x128xf32> -> vector<8x128xf32>
    %cst_6 = arith.constant 9.99999974E-6 : f32
    %11 = vector.broadcast %cst_6 : f32 to vector<8x128xf32>
    %12 = arith.maximumf %10, %11 : vector<8x128xf32>
    %13 = math.log %12 : vector<8x128xf32>
    %cst_7 = arith.constant 0.434294492 : f32
    %14 = vector.broadcast %cst_7 : f32 to vector<8x128xf32>
    %15 = arith.mulf %13, %14 : vector<8x128xf32>
    %c0_8 = arith.constant 0 : index
    %c0_9 = arith.constant 0 : index
    %16 = vector.load %arg4[%c0_8, %c0_9] : memref<8x128xf32, #tpu.memory_space<vmem>>, vector<8x128xf32>
    tpu.vector_store %arg4[%c0_8, %c0_9], %15 {strides = array<i32>} : memref<8x128xf32, #tpu.memory_space<vmem>>, vector<8x128xf32>,
    return
  }
  func.func @transform_0(%arg0: i32) -> (i32, i32) {
    %c0_i32 = arith.constant 0 : i32
    %c0_i32_0 = arith.constant 0 : i32
    return %arg0, %c0_i32 : i32, i32
  }
  func.func @transform_1(%arg0: i32) -> (i32, i32) {
    %c0_i32 = arith.constant 0 : i32
    %c0_i32_0 = arith.constant 0 : i32
    %c0_i32_1 = arith.constant 0 : i32
    return %c0_i32, %c0_i32_0 : i32, i32
  }
  func.func @transform_2(%arg0: i32) -> (i32, i32) {
    %c0_i32 = arith.constant 0 : i32
    %c0_i32_0 = arith.constant 0 : i32
    %c0_i32_1 = arith.constant 0 : i32
    return %c0_i32, %c0_i32_0 : i32, i32
  }
  func.func @transform_3(%arg0: i32) -> (i32, i32) {
    %c0_i32 = arith.constant 0 : i32
    %c0_i32_0 = arith.constant 0 : i32
    return %arg0, %c0_i32 : i32, i32
  }
}

</mosaic_0001>

<bundles_post_ra>
// kernel: tpu_custom_call.1
= control target key start
LH: loop header
LB: loop body
LE: loop exit
PB: predicated region body
PF: predicated region fallthrough
CT: control target
= control target key end

     0   :  { %8 = vsyncpa [#allocation3], 0  ;;  %s886_s0 = inlined_call_operand.hbm [shape: f32[16,128], index: 0, kind: input, shape index: {}]   ;;  %s887_s1 = inlined_call_operand.hbm [shape: f32[128,256], index: 1, kind: input, shape index: {}]   ;;  %s888_s2 = inlined_call_operand.hbm [shape: f32[128,128], index: 2, kind: input, shape index: {}]   ;;  %s889_s3 = inlined_call_operand.hbm [shape: f32[16,128], index: 3, kind: output, shape index: {}]  }
   0x1   :  { %10 = vsyncpa [#allocation3 + $0x1], 0 }
   0x2   :  { %11 = vsyncpa [#allocation6], 0 }
   0x3   :  { %12 = vsyncpa [#allocation4], 0 }
   0x4   :  { %14 = vsyncpa [#allocation4 + $0x1], 0  ;;  %s734_s12 = smov 0   ;;  %s736_s13 = smov 0  }
   0x5   :  { %s738_s14 = smov 0   ;;  %s740_s15 = smov 0  }
   0x6 LB: > { %s130_s18 = sshll.u32 %s887_s1, 4  ;;  %s758_s19 = sadd.s32 4294967295, %s706_s15   ;;  %s706_s15 = sphi %s740_s15, %s900_s15   ;;  %s702_s14 = sphi %s738_s14, %s899_s14   ;;  %s698_s13 = sphi %s736_s13, %s898_s13   ;;  %s694_s12 = sphi %s734_s12, %s897_s12   ;;  %s131_s18 = int_to_ptr.hbm [resolvable:$true] %s130_s18 }
   0x7   : > { %p456_p0 = scmp.ge.s32.totalorder %s706_s15, 1  ;;  %p41_p1 = scmp.eq.s32.totalorder %s758_s19, 0 }
   0x8   : > { %p119_p2 = scmp.lt.s32.totalorder %s706_s15, 3  ;;  %s708_s21 = smov [#allocation5]  }
   0x9   : > { %s132_s22 = sshll.u32 %s708_s21, 4  ;;  %s144_s25 = sshll.u32 %s888_s2, 4  ;;  %s133_s22 = int_to_ptr.vmem [resolvable:$true] %s132_s22  ;;  %s145_s25 = int_to_ptr.hbm [resolvable:$true] %s144_s25 }
   0xa   : > { %p763_p3 = pnand %p456_p0, %p119_p2  ;;  %s709_s26 = smov [#allocation7]  }
   0xb   : > { %s146_s27 = sshll.u32 %s709_s26, 4  ;;  %s710_s28 = smov 256   ;;  %s147_s27 = int_to_ptr.vmem [resolvable:$true] %s146_s27 }
   0xc   : > { %p483_p4 = pneg %p763_p3  ;;  %s711_s29 = smov 16  }
   0xd   : > { %s712_s30 = smov 128   ;;  %s713_s4 = smov 8  }
   0xe   : > { %p484_p6 = pnand %p483_p4, %p41_p1  ;;  %s455_s5 = sadd.s32 4294967294, %s706_s15  }
   0xf   : > { %s777_s6 = sadd.s32 1, %s706_s15   ;;  %s27_s8 = sadd.s32 1, %s702_s14 }
  0x10   : > { %486 = dma.hbm_to_vmem [thread:$0]  (!%p484_p6), %s131_s18, 4096, %s133_s22, [#allocation6], %s710_s28, %s710_s28, %s711_s29  }
  0x11   : > { %489 = dma.hbm_to_vmem [thread:$0]  (!%p484_p6), %s145_s25, 2048, %s147_s27, [#allocation6], %s712_s30, %s712_s30, %s713_s4  }
  0x12   : > { %s24_s7 = ssub.s32 %s706_s15, %s777_s6  ;;  %p34_p8 = scmp.ne.s32.totalorder %s702_s14, %s698_s13 }
  0x13   : > { %p25_p7 = scmp.eq.s32.totalorder %s24_s7, 0  ;;  %p35_p9 = scmp.eq.s32.totalorder %s706_s15, 0 }
  0x14   : > { %p40_p10 = scmp.ne.s32.totalorder %s698_s13, %s694_s12  ;;  %p106_p13 = scmp.eq.s32.totalorder %s758_s19, 1 }
  0x15   : > { %s788_s9 = scalar_select %p25_p7, %s702_s14, %s27_s8  }
  0x16   : > { %p790_p11 = por %p35_p9, %p34_p8  ;;  %p796_p12 = por %p41_p1, %p40_p10 }
  0x17   : > { %p112_p0 = scmp.eq.s32.totalorder %s455_s5, 1  ;;  %p500_p2 = scmp.lt.s32.totalorder %s706_s15, 2 }
  0x18   : > { %s160_s16 = sand.u32 1, %s702_s14   ;;  %p803_p4 = por %p106_p13, %p34_p8 }
  0x19   : > { %p807_p6 = por %p112_p0, %p40_p10  ;;  %s460_s21 = sshll.u32 %s160_s16, 3 }
  0x1a   : > { %s461_s22 = sshll.u32 %s706_s15, 3  ;;  %s164_s26 = scalar_lea.vmem [#allocation2], %s460_s21 }
  0x1b   : > { %s168_s25 = scalar_lea.hbm %s886_s0, %s461_s22  ;;  %s172_s27 = sshll.u32 %s164_s26, 4  ;;  %s173_s27 = int_to_ptr.vmem [resolvable:$true] %s172_s27 }
  0x1c   : > { %s170_s28 = sshll.u32 %s168_s25, 4  ;;  %p817_p7 = pnand %p500_p2, %p790_p11  ;;  %s171_s28 = int_to_ptr.hbm [resolvable:$true] %s170_s28 }
  0x1d   : > { %s161_s30 = scalar_lea.sflag [#allocation3], %s160_s16  ;;  %s606_s4 = sshra.s32 %s171_s28, 4  ;;  %s607_s4 = int_to_ptr.hbm [resolvable:$true] %s606_s4 }
  0x1e   : > { %s608_s5 = scalar_lea.hbm %s607_s4, 8  ;;  %p610_p9 = pneg %p817_p7 }
  0x1f   : > { %p609_p8 = scmp.ne.s32.totalorder %s607_s4, %s608_s5  ;;  %s613_s21 = scalar_lea.hbm %s886_s0, 16 }
  0x20   : > { %p614_p11 = scmp.lt.s32.totalorder %s607_s4, %s886_s0  ;;  %p615_p0 = scmp.lt.s32.totalorder %s613_s21, %s608_s5 }
  0x21   : > { %p611_p10 = pnand %p610_p9, %p609_p8 }
  0x22   : > { %p616_p2 = por %p615_p0, %p614_p11 }
  0x23   : > { %p612_p13 = pneg %p611_p10 }
  0x25   : > { %p617_p5 = pnand %p616_p2, %p612_p13 }
  0x27   : > { %620 = shalt.err (!%p617_p5)
}
  0x28   : > { %493 = dma.hbm_to_vmem [thread:$0]  (!%p817_p7), %s171_s28, 128, %s173_s27, %s161_s30  }
  0x29   : > { %181 = sbr.rel (%p763_p3) target bundleno = 380 (0x17c), region = 32  ;;  %s834_s16 = sand.u32 (!%p763_p3), 1, %s698_s13  }
  0x2a   : > { %s463_s23 = sshll.u32 (!%p763_p3), %s834_s16, 3  ;;  %s184_s24 = scalar_lea.sflag (!%p763_p3), [#allocation3], %s834_s16 }
  0x2b   : > { %s840_s25 = scalar_lea.vmem (!%p763_p3), [#allocation2], %s463_s23 }
  0x2e   : > { %681 = dma.done.wait (%p796_p12), %s184_s24, 128  }
  0x2f   : > { %683 = vsyncadd (%p796_p12), %s184_s24, 4294967168 }
  0x30   : > { %685 = dma.done.wait (%p41_p1), [#allocation6], 6144  }
  0x31   : > { %687 = vsyncadd (%p41_p1), [#allocation6], 4294961152  ;;  %v252_v0 = vld [vmem:[#allocation5 + $0xf0] sm:$0xff]  ;;  %v253_v1 = vld [vmem:[#allocation5 + $0xf8] sm:$0xff]  ;;  %s468_s20 = sshll.u32 %s758_s19, 3  ;;  %s220_s28 = scalar_lea.vmem [#allocation8], %s463_s23 }
  0x32   : > { %v250_v2 = vld [vmem:[#allocation5 + $0xe0] sm:$0xff]  ;;  %254 = vmatpush.msra.mxu0 %v252_v0  ;;  %274 = vmatpush.msra.mxu1 %v253_v1  ;;  %v251_v3 = vld [vmem:[#allocation5 + $0xe8] sm:$0xff]  ;;  %v248_v4 = vld [vmem:[#allocation5 + $0xd0] sm:$0xff]  ;;  %s361_s27 = scalar_lea.hbm %s889_s3, %s468_s20  ;;  %s363_s29 = sshll.u32 %s220_s28, 4  ;;  %s364_s29 = int_to_ptr.vmem [resolvable:$true] %s363_s29 }
  0x33   : > { %v249_v5 = vld [vmem:[#allocation5 + $0xd8] sm:$0xff]  ;;  %v246_v6 = vld [vmem:[#allocation5 + $0xc0] sm:$0xff]  ;;  %v247_v7 = vld [vmem:[#allocation5 + $0xc8] sm:$0xff]  ;;  %s365_s30 = sshll.u32 %s361_s27, 4  ;;  %s351_s4 = scalar_lea.sflag [#allocation4], %s834_s16  ;;  %s366_s30 = int_to_ptr.hbm [resolvable:$true] %s365_s30 }
  0x34   : > { %255 = vmatpush.msra.mxu0 %v250_v2  ;;  %275 = vmatpush.msra.mxu1 %v251_v3  ;;  %v244_v8 = vld [vmem:[#allocation5 + $0xb0] sm:$0xff]  ;;  %v245_v9 = vld [vmem:[#allocation5 + $0xb8] sm:$0xff]  ;;  %v242_v10 = vld [vmem:[#allocation5 + $0xa0] sm:$0xff]  ;;  %s650_s5 = sshra.s32 %s366_s30, 4  ;;  %s656_s21 = scalar_lea.hbm %s889_s3, 16  ;;  %s651_s5 = int_to_ptr.hbm [resolvable:$true] %s650_s5 }
  0x35   : > { %v243_v11 = vld [vmem:[#allocation5 + $0xa8] sm:$0xff]  ;;  %v240_v12 = vld [vmem:[#allocation5 + $0x90] sm:$0xff]  ;;  %v241_v13 = vld [vmem:[#allocation5 + $0x98] sm:$0xff]  ;;  %s652_s7 = scalar_lea.hbm %s651_s5, 8  ;;  %p657_p12 = scmp.lt.s32.totalorder %s651_s5, %s889_s3 }
  0x36   : > { %256 = vmatpush.msra.mxu0 %v248_v4  ;;  %276 = vmatpush.msra.mxu1 %v249_v5  ;;  %v324_v14 = vld [vmem:[#allocation7 + $0x78] sm:$0xff]  ;;  %v323_v15 = vld [vmem:[#allocation7 + $0x70] sm:$0xff]  ;;  %v238_v16 = vld [vmem:[#allocation5 + $0x80] sm:$0xff]  ;;  %p653_p1 = scmp.ne.s32.totalorder %s651_s5, %s652_s7  ;;  %p658_p7 = scmp.lt.s32.totalorder %s656_s21, %s652_s7 }
  0x37   : > { %v239_v17 = vld [vmem:[#allocation5 + $0x88] sm:$0xff]  ;;  %325 = vmatpush.msra.mxu2 %v324_v14  ;;  %v236_v19 = vld [vmem:[#allocation5 + $0x70] sm:$0xff]  ;;  %v237_v20 = vld [vmem:[#allocation5 + $0x78] sm:$0xff] }
  0x38   : > { %257 = vmatpush.msra.mxu0 %v246_v6  ;;  %277 = vmatpush.msra.mxu1 %v247_v7  ;;  %v322_v18 = vld [vmem:[#allocation7 + $0x68] sm:$0xff]  ;;  %v234_v21 = vld [vmem:[#allocation5 + $0x60] sm:$0xff]  ;;  %v232_v23 = vld [vmem:[#allocation5 + $0x50] sm:$0xff]  ;;  %p654_p3 = pnand %p653_p1, %p803_p4  ;;  %p659_p8 = por %p658_p7, %p657_p12 }
  0x39   : > { %326 = vmatpush.msra.mxu2 %v323_v15  ;;  %v235_v22 = vld [vmem:[#allocation5 + $0x68] sm:$0xff]  ;;  %v233_v24 = vld [vmem:[#allocation5 + $0x58] sm:$0xff]  ;;  %v230_v25 = vld [vmem:[#allocation5 + $0x40] sm:$0xff] }
  0x3a   : > { %258 = vmatpush.msra.mxu0 %v244_v8  ;;  %278 = vmatpush.msra.mxu1 %v245_v9  ;;  %v231_v26 = vld [vmem:[#allocation5 + $0x48] sm:$0xff]  ;;  %v228_v27 = vld [vmem:[#allocation5 + $0x30] sm:$0xff]  ;;  %v229_v28 = vld [vmem:[#allocation5 + $0x38] sm:$0xff]  ;;  %p655_p5 = pneg %p654_p3 }
  0x3b   : > { %327 = vmatpush.msra.mxu2 %v322_v18  ;;  %v226_v29 = vld [vmem:[#allocation5 + $0x20] sm:$0xff]  ;;  %v227_v30 = vld [vmem:[#allocation5 + $0x28] sm:$0xff]  ;;  %v224_v31 = vld [vmem:[#allocation5 + $0x10] sm:$0xff] }
  0x3c   : > { %259 = vmatpush.msra.mxu0 %v242_v10  ;;  %279 = vmatpush.msra.mxu1 %v243_v11  ;;  %v225_v32 = vld [vmem:[#allocation5 + $0x18] sm:$0xff]  ;;  %v222_v33 = vld [vmem:[#allocation5] sm:$0xff]  ;;  %v223_v34 = vld [vmem:[#allocation5 + $0x8] sm:$0xff]  ;;  %p660_p9 = pnand %p659_p8, %p655_p5 }
  0x3d   : > { %v221_v35 = vld [vmem:[%s840_s25] sm:$0xff]  ;;  %v321_v36 = vld [vmem:[#allocation7 + $0x60] sm:$0xff]  ;;  %v318_v39 = vld [vmem:[#allocation7 + $0x48] sm:$0xff] }
  0x3e   : > { %260 = vmatpush.msra.mxu0 %v240_v12  ;;  %280 = vmatpush.msra.mxu1 %v241_v13  ;;  %v320_v37 = vld [vmem:[#allocation7 + $0x58] sm:$0xff]  ;;  %v319_v38 = vld [vmem:[#allocation7 + $0x50] sm:$0xff]  ;;  %v317_v40 = vld [vmem:[#allocation7 + $0x40] sm:$0xff] }
  0x3f   : > { %328 = vmatpush.msra.mxu2 %v321_v36  ;;  %v316_v41 = vld [vmem:[#allocation7 + $0x38] sm:$0xff]  ;;  %v315_v42 = vld [vmem:[#allocation7 + $0x30] sm:$0xff]  ;;  %v314_v43 = vld [vmem:[#allocation7 + $0x28] sm:$0xff] }
  0x40   : > { %261 = vmatpush.msra.mxu0 %v238_v16  ;;  %281 = vmatpush.msra.mxu1 %v239_v17  ;;  %v313_v44 = vld [vmem:[#allocation7 + $0x20] sm:$0xff]  ;;  %v312_v45 = vld [vmem:[#allocation7 + $0x18] sm:$0xff]  ;;  %v311_v46 = vld [vmem:[#allocation7 + $0x10] sm:$0xff] }
  0x41   : > { %329 = vmatpush.msra.mxu2 %v320_v37  ;;  %v310_v47 = vld [vmem:[#allocation7 + $0x8] sm:$0xff]  ;;  %v309_v48 = vld [vmem:[#allocation7] sm:$0xff] }
  0x42   : > { %262 = vmatpush.msra.mxu0 %v236_v19  ;;  %282 = vmatpush.msra.mxu1 %v237_v20 }
  0x43   : > { %330 = vmatpush.msra.mxu2 %v319_v38 }
  0x44   : > { %263 = vmatpush.msra.mxu0 %v234_v21  ;;  %283 = vmatpush.msra.mxu1 %v235_v22 }
  0x45   : > { %331 = vmatpush.msra.mxu2 %v318_v39 }
  0x46   : > { %264 = vmatpush.msra.mxu0 %v232_v23  ;;  %284 = vmatpush.msra.mxu1 %v233_v24 }
  0x47   : > { %332 = vmatpush.msra.mxu2 %v317_v40 }
  0x48   : > { %265 = vmatpush.msra.mxu0 %v230_v25  ;;  %285 = vmatpush.msra.mxu1 %v231_v26 }
  0x49   : > { %333 = vmatpush.msra.mxu2 %v316_v41 }
  0x4a   : > { %266 = vmatpush.msra.mxu0 %v228_v27  ;;  %286 = vmatpush.msra.mxu1 %v229_v28 }
  0x4b   : > { %334 = vmatpush.msra.mxu2 %v315_v42 }
  0x4c   : > { %267 = vmatpush.msra.mxu0 %v226_v29  ;;  %287 = vmatpush.msra.mxu1 %v227_v30 }
  0x4d   : > { %335 = vmatpush.msra.mxu2 %v314_v43 }
  0x4e   : > { %268 = vmatpush.msra.mxu0 %v224_v31  ;;  %288 = vmatpush.msra.mxu1 %v225_v32 }
  0x4f   : > { %336 = vmatpush.msra.mxu2 %v313_v44 }
  0x50   : > { %269 = vmatpush.msra.mxu0 %v222_v33  ;;  %289 = vmatpush.msra.mxu1 %v223_v34 }
  0x51   : > { %270 = vmatmul.f32.vlgmr.msra.gmra.mxu0 %v221_v35  ;;  %290 = vmatmul.f32.vlgmr.msra.gmra.mxu1 %v221_v35 }
  0x52   : > { %337 = vmatpush.msra.mxu2 %v312_v45 }
  0x54   : > { %338 = vmatpush.msra.mxu2 %v311_v46 }
  0x56   : > { %339 = vmatpush.msra.mxu2 %v310_v47 }
  0x58   : > { %340 = vmatpush.msra.mxu2 %v309_v48 }
  0xce   : > { %v271_v49 = vpop.f32.mrf.mxu0  ;;  %v291_v50 = vpop.f32.mrf.mxu1 }
  0xcf   : > { %v294_v51 = vmul.f32 %v271_v49, %v271_v49  ;;  %v295_v52 = vmul.f32 %v291_v50, %v291_v50 }
  0xd1   : > { %v296_v53 = vadd.f32 %v295_v52, %v294_v51 }
  0xd3   : > { %542 = vrsqrt.f32 %v296_v53  ;;  %vm304_vm0 = vcmp.eq.f32.partialorder %v296_v53, inf  ;;  %v307_v61 = vand.u32 2147483648, %v296_v53  ;;  %vm306_vm1 = vcmp.eq.f32.partialorder %v296_v53, 0.0 }
  0xd9   : > { %v543_v54 = vpop.eup %542 }
  0xda   : > { %v298_v55 = vmul.f32 %v543_v54, %v296_v53 }
  0xdc   : > { %v299_v56 = vmul.f32 %v543_v54, %v298_v55 }
  0xde   : > { %v300_v57 = vmul.f32 0.5, %v299_v56 }
  0xe0   : > { %v301_v58 = vsub.f32 1.5, %v300_v57 }
  0xe2   : > { %v302_v59 = vmul.f32 %v543_v54, %v301_v58 }
  0xe4   : > { %v303_v60 = vmul.f32 %v302_v59, %v296_v53 }
  0xe6   : > { %v305_v62 = vsel %vm304_vm0, %v296_v53, %v303_v60 }
  0xe7   : > { %v308_v63 = vsel %vm306_vm1, %v307_v61, %v305_v62 }
  0xe8   : > { %341 = vmatmul.f32.vlgmr.msra.gmra.mxu2 %v308_v63 }
 0x16b   : > { %v342_v0 = vpop.f32.mrf.mxu2 }
 0x16c   : > { %v345_v1 = vmax.f32 %v342_v0, 1e-05 }
 0x16e   : > { %544 = vlog2.f32 %v345_v1 }
 0x174   : > { %v545_v2 = vpop.eup %544 }
 0x175   : > { %v347_v3 = vmul.f32 0.6931472, %v545_v2 }
 0x177   : > { %v348_v4 = vmul.f32 0.4342945, %v347_v3 }
 0x179   : > { %349 = vst [vmem:[%s220_s28] sm:$0xff] %v348_v4 }
 0x17a   : > { %663 = shalt.err (!%p660_p9)
}
 0x17b   : > { %481 = dma.vmem_to_hbm [thread:$0]  (%p803_p4), %s364_s29, 128, %s366_s30, %s351_s4  }
 0x17c PF: > { %s377_s16 = sand.u32 1, %s694_s12   ;;  %p896_p10 = scmp.ge.s32.totalorder %s706_s15, 2 }
 0x17d   : > { %s378_s23 = scalar_lea.sflag [#allocation4], %s377_s16 }
 0x17e   : > { %p495_p13 = pnand %p896_p10, %p807_p6 }
 0x180   : > { %p496_p11 = pneg %p495_p13 }
 0x182   : > { %689 = dma.done.wait (%p496_p11), %s378_s23, 128  }
 0x183   : > { %691 = vsyncadd (%p496_p11), %s378_s23, 4294967168  ;;  %p17_p0 = scmp.ge.s32.totalorder %s777_s6, 4   ;;  %s897_s12 = smov %s698_s13 }
 0x184   : > { %s898_s13 = smov %s702_s14  ;;  %s899_s14 = smov %s788_s9 }
 0x185   : > { %s900_s15 = smov %s777_s6  ;;  %19 = sbr.rel (!%p17_p0) target bundleno = 6 (0x6), region = 85 }
 0x18a   :  { %384 = vsyncpa [#allocation3], 1 }
 0x18b   :  { %386 = vsyncpa [#allocation3 + $0x1], 1 }
 0x18c   :  { %387 = vsyncpa [#allocation6], 1 }
 0x18d   :  { %388 = vsyncpa [#allocation4], 1 }
 0x18e   :  { %390 = vsyncpa [#allocation4 + $0x1], 1 }

</bundles_post_ra>
